<compile_context>
chip_gen: v7x
topology: tpu7x:2x2x1
jax: 0.10.0
libtpu: 0.0.40
codegen_flags: <defaults>
</compile_context>

<pallas_src>
import functools

import jax
import jax.numpy as jnp
from jax.experimental import pallas as pl
from jax.experimental.pallas import tpu as pltpu


def lstm_linear_kernel(x_ref, h0_ref, c0_ref, wih_ref, whh_ref, b_ref,
                       wlin_ref, blin_ref, y_ref, hn_ref, cn_ref, hs_ref,
                       *, seq_len, batch):
    """x_ref: (T*B, I) time-major flattened; hs_ref: (T*B, H) VMEM scratch."""
    T, B = seq_len, batch
    H = h0_ref.shape[-1]

    wih = wih_ref[...]        # (I, 4H)  == weight_ih_l0.T
    whh = whh_ref[...]        # (H, 4H)  == weight_hh_l0.T
    b = b_ref[...]            # (1, 4H)  == bias_ih_l0 + bias_hh_l0

    # Hoisted input projection (+ bias): one matmul outside the recurrence.
    gates_x = jnp.dot(x_ref[...], wih, preferred_element_type=jnp.float32) + b   # (T*B, 4H)

    h = h0_ref[...]           # (B, H)
    c = c0_ref[...]           # (B, H)

    # Statically unrolled recurrence; only h @ W_hh is sequential work per step.
    for t in range(T):
        g = gates_x[t * B:(t + 1) * B, :] + jnp.dot(
            h, whh, preferred_element_type=jnp.float32)                          # (B, 4H)
        # PyTorch gate order: i, f, g, o
        i_g = jax.nn.sigmoid(g[:, 0 * H:1 * H])
        f_g = jax.nn.sigmoid(g[:, 1 * H:2 * H])
        g_g = jnp.tanh(g[:, 2 * H:3 * H])
        o_g = jax.nn.sigmoid(g[:, 3 * H:4 * H])
        c = f_g * c + i_g * g_g
        h = o_g * jnp.tanh(c)
        hs_ref[pl.ds(t * B, B), :] = h     # stream h_t to VMEM scratch (time-major slab)

    hn_ref[...] = h
    cn_ref[...] = c

    # Flattened Linear head: single (T*B, H) @ (H, O) matmul + bias.
    y = jnp.dot(hs_ref[...], wlin_ref[...], preferred_element_type=jnp.float32) + blin_ref[...]
    y_ref[...] = y.astype(y_ref.dtype)


@jax.jit
def lstm_model_forward(inp, h0, c0, wih_t, whh_t, bias, wlin_t, blin):
    """inp: (B, T, I) batch-first; h0/c0: (1, B, H). Returns (out (B,T,O), (hn, cn))."""
    B, T, I = inp.shape
    H = h0.shape[-1]
    O = wlin_t.shape[-1]

    # Time-major, flattened input so the kernel's per-step gate slice is a contiguous
    # leading-axis slice and the input projection is one 2-D matmul.
    x_tm = jnp.transpose(inp, (1, 0, 2)).reshape(T * B, I)

    flops = 2 * T * B * I * 4 * H + 2 * T * B * H * 4 * H + 2 * T * B * H * O
    transcendentals = 6 * T * B * H
    bytes_accessed = 4 * (T * B * I + 2 * B * H            # x, h0, c0
                          + I * 4 * H + H * 4 * H + 4 * H  # W_ih, W_hh, bias
                          + H * O + O                      # linear W, b
                          + T * B * O + 2 * B * H)         # y, hn, cn

    vmem = pl.BlockSpec(memory_space=pltpu.MemorySpace.VMEM)
    y, hn, cn = pl.pallas_call(
        functools.partial(lstm_linear_kernel, seq_len=T, batch=B),
        out_shape=(
            jax.ShapeDtypeStruct((T * B, O), jnp.float32),
            jax.ShapeDtypeStruct((B, H), jnp.float32),
            jax.ShapeDtypeStruct((B, H), jnp.float32),
        ),
        in_specs=[vmem] * 8,
        out_specs=(vmem, vmem, vmem),
        scratch_shapes=[pltpu.VMEM((T * B, H), jnp.float32)],
        cost_estimate=pl.CostEstimate(flops=flops,
                                      transcendentals=transcendentals,
                                      bytes_accessed=bytes_accessed),
    )(x_tm, h0[0], c0[0], wih_t, whh_t, bias, wlin_t, blin)

    out = y.reshape(T, B, O).transpose(1, 0, 2)    # back to batch-first (B, T, O)
    return out, (hn[None], cn[None])


def _reference(inp, h0, c0, wih_t, whh_t, bias, wlin_t, blin):
    """Pure-JAX reference for correctness checking."""
    B, T, _ = inp.shape
    H = h0.shape[-1]
    h, c = h0[0], c0[0]
    hs = []
    for t in range(T):
        gates = inp[:, t, :] @ wih_t + h @ whh_t + bias
        i_g = jax.nn.sigmoid(gates[:, 0 * H:1 * H])
        f_g = jax.nn.sigmoid(gates[:, 1 * H:2 * H])
        g_g = jnp.tanh(gates[:, 2 * H:3 * H])
        o_g = jax.nn.sigmoid(gates[:, 3 * H:4 * H])
        c = f_g * c + i_g * g_g
        h = o_g * jnp.tanh(c)
        hs.append(h)
    hs = jnp.stack(hs, axis=1)                      # (B, T, H)
    out = hs @ wlin_t + blin[0]                     # (B, T, O)
    return out, (h[None], c[None])


if __name__ == "__main__":
    # Module hyperparameters (small, consistent with the PyTorch module).
    input_size, hidden_size, output_size = 16, 32, 8
    layers, num_directions = 1, 1               # standard (unidirectional) LSTM
    B, T = 2, 8

    key = jax.random.PRNGKey(0)
    ks = jax.random.split(key, 8)
    bound = 1.0 / jnp.sqrt(hidden_size)          # PyTorch default LSTM/Linear init scale

    # LSTM parameters (stored transposed for right-multiplication inside the kernel).
    wih_t = jax.random.uniform(ks[0], (input_size, 4 * hidden_size), jnp.float32, -bound, bound)
    whh_t = jax.random.uniform(ks[1], (hidden_size, 4 * hidden_size), jnp.float32, -bound, bound)
    b_ih = jax.random.uniform(ks[2], (4 * hidden_size,), jnp.float32, -bound, bound)
    b_hh = jax.random.uniform(ks[3], (4 * hidden_size,), jnp.float32, -bound, bound)
    bias = (b_ih + b_hh)[None, :]                # (1, 4H)

    # Linear head parameters.
    wlin_t = jax.random.uniform(ks[4], (hidden_size, output_size), jnp.float32, -bound, bound)
    blin = jax.random.uniform(ks[5], (output_size,), jnp.float32, -bound, bound)[None, :]

    # Inputs: x and init_hidden (zeros, like the module's init_hidden).
    x = jax.random.normal(ks[6], (B, T, input_size), jnp.float32)
    h0 = jnp.zeros((layers * num_directions, B, hidden_size), jnp.float32)
    c0 = jnp.zeros((layers * num_directions, B, hidden_size), jnp.float32)

    out, (hn, cn) = lstm_model_forward(x, h0, c0, wih_t, whh_t, bias, wlin_t, blin)
    jax.block_until_ready((out, hn, cn))

    ref_out, (ref_hn, ref_cn) = _reference(x, h0, c0, wih_t, whh_t, bias, wlin_t, blin)
    assert out.shape == (B, T, output_size)
    assert hn.shape == (1, B, hidden_size) and cn.shape == (1, B, hidden_size)
    assert jnp.allclose(out, ref_out, atol=1e-5, rtol=1e-5)
    assert jnp.allclose(hn, ref_hn, atol=1e-5, rtol=1e-5)
    assert jnp.allclose(cn, ref_cn, atol=1e-5, rtol=1e-5)

    print("KERNEL_OK")
</pallas_src>

<mosaic_0001>
module attributes {stable_mosaic.version = 11 : i64} {
  func.func @lstm_linear_kernel(%arg0: memref<16x16xf32, #tpu.memory_space<vmem>>, %arg1: memref<2x32xf32, #tpu.memory_space<vmem>>, %arg2: memref<2x32xf32, #tpu.memory_space<vmem>>, %arg3: memref<16x128xf32, #tpu.memory_space<vmem>>, %arg4: memref<32x128xf32, #tpu.memory_space<vmem>>, %arg5: memref<1x128xf32, #tpu.memory_space<vmem>>, %arg6: memref<32x8xf32, #tpu.memory_space<vmem>>, %arg7: memref<1x8xf32, #tpu.memory_space<vmem>>, %arg8: memref<16x8xf32, #tpu.memory_space<vmem>>, %arg9: memref<2x32xf32, #tpu.memory_space<vmem>>, %arg10: memref<2x32xf32, #tpu.memory_space<vmem>>, %arg11: memref<16x32xf32, #tpu.memory_space<vmem>>) attributes {dimension_semantics = [], scalar_prefetch = 0 : i64, scratch_operands = 1 : i64, tpu.core_type = #tpu.core_type<tc>} {
    %c0 = arith.constant 0 : index
    %c0_0 = arith.constant 0 : index
    %0 = vector.load %arg3[%c0, %c0_0] : memref<16x128xf32, #tpu.memory_space<vmem>>, vector<16x128xf32>
    %c0_1 = arith.constant 0 : index
    %c0_2 = arith.constant 0 : index
    %1 = vector.load %arg4[%c0_1, %c0_2] : memref<32x128xf32, #tpu.memory_space<vmem>>, vector<32x128xf32>
    %c0_3 = arith.constant 0 : index
    %c0_4 = arith.constant 0 : index
    %2 = vector.load %arg5[%c0_3, %c0_4] : memref<1x128xf32, #tpu.memory_space<vmem>>, vector<1x128xf32>
    %c0_5 = arith.constant 0 : index
    %c0_6 = arith.constant 0 : index
    %3 = vector.load %arg0[%c0_5, %c0_6] : memref<16x16xf32, #tpu.memory_space<vmem>>, vector<16x16xf32>
    %cst = arith.constant dense<0.000000e+00> : vector<16x128xf32>
    %4 = tpu.matmul %3, %0, %cst {dimension_numbers = #tpu.dot_dimension_numbers<[1], [0], [0], [1], [0, 0, 1, 1], [], []>} : vector<16x16xf32>, vector<16x128xf32>, vector<16x128xf32> -> vector<16x128xf32>
    %5 = vector.broadcast %2 : vector<1x128xf32> to vector<16x128xf32>
    %6 = arith.addf %4, %5 : vector<16x128xf32>
    %c0_7 = arith.constant 0 : index
    %c0_8 = arith.constant 0 : index
    %7 = vector.load %arg1[%c0_7, %c0_8] : memref<2x32xf32, #tpu.memory_space<vmem>>, vector<2x32xf32>
    %c0_9 = arith.constant 0 : index
    %c0_10 = arith.constant 0 : index
    %8 = vector.load %arg2[%c0_9, %c0_10] : memref<2x32xf32, #tpu.memory_space<vmem>>, vector<2x32xf32>
    %9 = vector.extract_strided_slice %6 {offsets = [0, 0], sizes = [2, 128], strides = [1, 1]} : vector<16x128xf32> to vector<2x128xf32>
    %cst_11 = arith.constant dense<0.000000e+00> : vector<2x128xf32>
    %10 = tpu.matmul %7, %1, %cst_11 {dimension_numbers = #tpu.dot_dimension_numbers<[1], [0], [0], [1], [0, 0, 1, 1], [], []>} : vector<2x32xf32>, vector<32x128xf32>, vector<2x128xf32> -> vector<2x128xf32>
    %11 = arith.addf %9, %10 : vector<2x128xf32>
    %12 = vector.extract_strided_slice %11 {offsets = [0, 0], sizes = [2, 32], strides = [1, 1]} : vector<2x128xf32> to vector<2x32xf32>
    %13 = arith.negf %12 : vector<2x32xf32>
    %14 = math.exp %13 : vector<2x32xf32>
    %cst_12 = arith.constant 1.000000e+00 : f32
    %15 = vector.broadcast %cst_12 : f32 to vector<2x32xf32>
    %16 = arith.addf %15, %14 : vector<2x32xf32>
    %17 = arith.divf %15, %16 : vector<2x32xf32>
    %18 = vector.extract_strided_slice %11 {offsets = [0, 32], sizes = [2, 32], strides = [1, 1]} : vector<2x128xf32> to vector<2x32xf32>
    %19 = arith.negf %18 : vector<2x32xf32>
    %20 = math.exp %19 : vector<2x32xf32>
    %cst_13 = arith.constant 1.000000e+00 : f32
    %21 = vector.broadcast %cst_13 : f32 to vector<2x32xf32>
    %22 = arith.addf %21, %20 : vector<2x32xf32>
    %23 = arith.divf %21, %22 : vector<2x32xf32>
    %24 = vector.extract_strided_slice %11 {offsets = [0, 64], sizes = [2, 32], strides = [1, 1]} : vector<2x128xf32> to vector<2x32xf32>
    %25 = math.tanh %24 : vector<2x32xf32>
    %26 = vector.extract_strided_slice %11 {offsets = [0, 96], sizes = [2, 32], strides = [1, 1]} : vector<2x128xf32> to vector<2x32xf32>
    %27 = arith.negf %26 : vector<2x32xf32>
    %28 = math.exp %27 : vector<2x32xf32>
    %cst_14 = arith.constant 1.000000e+00 : f32
    %29 = vector.broadcast %cst_14 : f32 to vector<2x32xf32>
    %30 = arith.addf %29, %28 : vector<2x32xf32>
    %31 = arith.divf %29, %30 : vector<2x32xf32>
    %32 = arith.mulf %23, %8 : vector<2x32xf32>
    %33 = arith.mulf %17, %25 : vector<2x32xf32>
    %34 = arith.addf %32, %33 : vector<2x32xf32>
    %35 = math.tanh %34 : vector<2x32xf32>
    %36 = arith.mulf %31, %35 : vector<2x32xf32>
    %c0_15 = arith.constant 0 : index
    %c0_16 = arith.constant 0 : index
    %37 = vector.load %arg11[%c0_15, %c0_16] : memref<16x32xf32, #tpu.memory_space<vmem>>, vector<2x32xf32>
    tpu.vector_store %arg11[%c0_15, %c0_16], %36 {strides = array<i32>} : memref<16x32xf32, #tpu.memory_space<vmem>>, vector<2x32xf32>,
    %38 = vector.extract_strided_slice %6 {offsets = [2, 0], sizes = [2, 128], strides = [1, 1]} : vector<16x128xf32> to vector<2x128xf32>
    %cst_17 = arith.constant dense<0.000000e+00> : vector<2x128xf32>
    %39 = tpu.matmul %36, %1, %cst_17 {dimension_numbers = #tpu.dot_dimension_numbers<[1], [0], [0], [1], [0, 0, 1, 1], [], []>} : vector<2x32xf32>, vector<32x128xf32>, vector<2x128xf32> -> vector<2x128xf32>
    %40 = arith.addf %38, %39 : vector<2x128xf32>
    %41 = vector.extract_strided_slice %40 {offsets = [0, 0], sizes = [2, 32], strides = [1, 1]} : vector<2x128xf32> to vector<2x32xf32>
    %42 = arith.negf %41 : vector<2x32xf32>
    %43 = math.exp %42 : vector<2x32xf32>
    %cst_18 = arith.constant 1.000000e+00 : f32
    %44 = vector.broadcast %cst_18 : f32 to vector<2x32xf32>
    %45 = arith.addf %44, %43 : vector<2x32xf32>
    %46 = arith.divf %44, %45 : vector<2x32xf32>
    %47 = vector.extract_strided_slice %40 {offsets = [0, 32], sizes = [2, 32], strides = [1, 1]} : vector<2x128xf32> to vector<2x32xf32>
    %48 = arith.negf %47 : vector<2x32xf32>
    %49 = math.exp %48 : vector<2x32xf32>
    %cst_19 = arith.constant 1.000000e+00 : f32
    %50 = vector.broadcast %cst_19 : f32 to vector<2x32xf32>
    %51 = arith.addf %50, %49 : vector<2x32xf32>
    %52 = arith.divf %50, %51 : vector<2x32xf32>
    %53 = vector.extract_strided_slice %40 {offsets = [0, 64], sizes = [2, 32], strides = [1, 1]} : vector<2x128xf32> to vector<2x32xf32>
    %54 = math.tanh %53 : vector<2x32xf32>
    %55 = vector.extract_strided_slice %40 {offsets = [0, 96], sizes = [2, 32], strides = [1, 1]} : vector<2x128xf32> to vector<2x32xf32>
    %56 = arith.negf %55 : vector<2x32xf32>
    %57 = math.exp %56 : vector<2x32xf32>
    %cst_20 = arith.constant 1.000000e+00 : f32
    %58 = vector.broadcast %cst_20 : f32 to vector<2x32xf32>
    %59 = arith.addf %58, %57 : vector<2x32xf32>
    %60 = arith.divf %58, %59 : vector<2x32xf32>
    %61 = arith.mulf %52, %34 : vector<2x32xf32>
    %62 = arith.mulf %46, %54 : vector<2x32xf32>
    %63 = arith.addf %61, %62 : vector<2x32xf32>
    %64 = math.tanh %63 : vector<2x32xf32>
    %65 = arith.mulf %60, %64 : vector<2x32xf32>
    %c2 = arith.constant 2 : index
    %c0_21 = arith.constant 0 : index
    %66 = vector.load %arg11[%c2, %c0_21] : memref<16x32xf32, #tpu.memory_space<vmem>>, vector<2x32xf32>
    tpu.vector_store %arg11[%c2, %c0_21], %65 {strides = array<i32>} : memref<16x32xf32, #tpu.memory_space<vmem>>, vector<2x32xf32>,
    %67 = vector.extract_strided_slice %6 {offsets = [4, 0], sizes = [2, 128], strides = [1, 1]} : vector<16x128xf32> to vector<2x128xf32>
    %cst_22 = arith.constant dense<0.000000e+00> : vector<2x128xf32>
    %68 = tpu.matmul %65, %1, %cst_22 {dimension_numbers = #tpu.dot_dimension_numbers<[1], [0], [0], [1], [0, 0, 1, 1], [], []>} : vector<2x32xf32>, vector<32x128xf32>, vector<2x128xf32> -> vector<2x128xf32>
    %69 = arith.addf %67, %68 : vector<2x128xf32>
    %70 = vector.extract_strided_slice %69 {offsets = [0, 0], sizes = [2, 32], strides = [1, 1]} : vector<2x128xf32> to vector<2x32xf32>
    %71 = arith.negf %70 : vector<2x32xf32>
    %72 = math.exp %71 : vector<2x32xf32>
    %cst_23 = arith.constant 1.000000e+00 : f32
    %73 = vector.broadcast %cst_23 : f32 to vector<2x32xf32>
    %74 = arith.addf %73, %72 : vector<2x32xf32>
    %75 = arith.divf %73, %74 : vector<2x32xf32>
    %76 = vector.extract_strided_slice %69 {offsets = [0, 32], sizes = [2, 32], strides = [1, 1]} : vector<2x128xf32> to vector<2x32xf32>
    %77 = arith.negf %76 : vector<2x32xf32>
    %78 = math.exp %77 : vector<2x32xf32>
    %cst_24 = arith.constant 1.000000e+00 : f32
    %79 = vector.broadcast %cst_24 : f32 to vector<2x32xf32>
    %80 = arith.addf %79, %78 : vector<2x32xf32>
    %81 = arith.divf %79, %80 : vector<2x32xf32>
    %82 = vector.extract_strided_slice %69 {offsets = [0, 64], sizes = [2, 32], strides = [1, 1]} : vector<2x128xf32> to vector<2x32xf32>
    %83 = math.tanh %82 : vector<2x32xf32>
    %84 = vector.extract_strided_slice %69 {offsets = [0, 96], sizes = [2, 32], strides = [1, 1]} : vector<2x128xf32> to vector<2x32xf32>
    %85 = arith.negf %84 : vector<2x32xf32>
    %86 = math.exp %85 : vector<2x32xf32>
    %cst_25 = arith.constant 1.000000e+00 : f32
    %87 = vector.broadcast %cst_25 : f32 to vector<2x32xf32>
    %88 = arith.addf %87, %86 : vector<2x32xf32>
    %89 = arith.divf %87, %88 : vector<2x32xf32>
    %90 = arith.mulf %81, %63 : vector<2x32xf32>
    %91 = arith.mulf %75, %83 : vector<2x32xf32>
    %92 = arith.addf %90, %91 : vector<2x32xf32>
    %93 = math.tanh %92 : vector<2x32xf32>
    %94 = arith.mulf %89, %93 : vector<2x32xf32>
    %c4 = arith.constant 4 : index
    %c0_26 = arith.constant 0 : index
    %95 = vector.load %arg11[%c4, %c0_26] : memref<16x32xf32, #tpu.memory_space<vmem>>, vector<2x32xf32>
    tpu.vector_store %arg11[%c4, %c0_26], %94 {strides = array<i32>} : memref<16x32xf32, #tpu.memory_space<vmem>>, vector<2x32xf32>,
    %96 = vector.extract_strided_slice %6 {offsets = [6, 0], sizes = [2, 128], strides = [1, 1]} : vector<16x128xf32> to vector<2x128xf32>
    %cst_27 = arith.constant dense<0.000000e+00> : vector<2x128xf32>
    %97 = tpu.matmul %94, %1, %cst_27 {dimension_numbers = #tpu.dot_dimension_numbers<[1], [0], [0], [1], [0, 0, 1, 1], [], []>} : vector<2x32xf32>, vector<32x128xf32>, vector<2x128xf32> -> vector<2x128xf32>
    %98 = arith.addf %96, %97 : vector<2x128xf32>
    %99 = vector.extract_strided_slice %98 {offsets = [0, 0], sizes = [2, 32], strides = [1, 1]} : vector<2x128xf32> to vector<2x32xf32>
    %100 = arith.negf %99 : vector<2x32xf32>
    %101 = math.exp %100 : vector<2x32xf32>
    %cst_28 = arith.constant 1.000000e+00 : f32
    %102 = vector.broadcast %cst_28 : f32 to vector<2x32xf32>
    %103 = arith.addf %102, %101 : vector<2x32xf32>
    %104 = arith.divf %102, %103 : vector<2x32xf32>
    %105 = vector.extract_strided_slice %98 {offsets = [0, 32], sizes = [2, 32], strides = [1, 1]} : vector<2x128xf32> to vector<2x32xf32>
    %106 = arith.negf %105 : vector<2x32xf32>
    %107 = math.exp %106 : vector<2x32xf32>
    %cst_29 = arith.constant 1.000000e+00 : f32
    %108 = vector.broadcast %cst_29 : f32 to vector<2x32xf32>
    %109 = arith.addf %108, %107 : vector<2x32xf32>
    %110 = arith.divf %108, %109 : vector<2x32xf32>
    %111 = vector.extract_strided_slice %98 {offsets = [0, 64], sizes = [2, 32], strides = [1, 1]} : vector<2x128xf32> to vector<2x32xf32>
    %112 = math.tanh %111 : vector<2x32xf32>
    %113 = vector.extract_strided_slice %98 {offsets = [0, 96], sizes = [2, 32], strides = [1, 1]} : vector<2x128xf32> to vector<2x32xf32>
    %114 = arith.negf %113 : vector<2x32xf32>
    %115 = math.exp %114 : vector<2x32xf32>
    %cst_30 = arith.constant 1.000000e+00 : f32
    %116 = vector.broadcast %cst_30 : f32 to vector<2x32xf32>
    %117 = arith.addf %116, %115 : vector<2x32xf32>
    %118 = arith.divf %116, %117 : vector<2x32xf32>
    %119 = arith.mulf %110, %92 : vector<2x32xf32>
    %120 = arith.mulf %104, %112 : vector<2x32xf32>
    %121 = arith.addf %119, %120 : vector<2x32xf32>
    %122 = math.tanh %121 : vector<2x32xf32>
    %123 = arith.mulf %118, %122 : vector<2x32xf32>
    %c6 = arith.constant 6 : index
    %c0_31 = arith.constant 0 : index
    %124 = vector.load %arg11[%c6, %c0_31] : memref<16x32xf32, #tpu.memory_space<vmem>>, vector<2x32xf32>
    tpu.vector_store %arg11[%c6, %c0_31], %123 {strides = array<i32>} : memref<16x32xf32, #tpu.memory_space<vmem>>, vector<2x32xf32>,
    %125 = vector.extract_strided_slice %6 {offsets = [8, 0], sizes = [2, 128], strides = [1, 1]} : vector<16x128xf32> to vector<2x128xf32>
    %cst_32 = arith.constant dense<0.000000e+00> : vector<2x128xf32>
    %126 = tpu.matmul %123, %1, %cst_32 {dimension_numbers = #tpu.dot_dimension_numbers<[1], [0], [0], [1], [0, 0, 1, 1], [], []>} : vector<2x32xf32>, vector<32x128xf32>, vector<2x128xf32> -> vector<2x128xf32>
    %127 = arith.addf %125, %126 : vector<2x128xf32>
    %128 = vector.extract_strided_slice %127 {offsets = [0, 0], sizes = [2, 32], strides = [1, 1]} : vector<2x128xf32> to vector<2x32xf32>
    %129 = arith.negf %128 : vector<2x32xf32>
    %130 = math.exp %129 : vector<2x32xf32>
    %cst_33 = arith.constant 1.000000e+00 : f32
    %131 = vector.broadcast %cst_33 : f32 to vector<2x32xf32>
    %132 = arith.addf %131, %130 : vector<2x32xf32>
    %133 = arith.divf %131, %132 : vector<2x32xf32>
    %134 = vector.extract_strided_slice %127 {offsets = [0, 32], sizes = [2, 32], strides = [1, 1]} : vector<2x128xf32> to vector<2x32xf32>
    %135 = arith.negf %134 : vector<2x32xf32>
    %136 = math.exp %135 : vector<2x32xf32>
    %cst_34 = arith.constant 1.000000e+00 : f32
    %137 = vector.broadcast %cst_34 : f32 to vector<2x32xf32>
    %138 = arith.addf %137, %136 : vector<2x32xf32>
    %139 = arith.divf %137, %138 : vector<2x32xf32>
    %140 = vector.extract_strided_slice %127 {offsets = [0, 64], sizes = [2, 32], strides = [1, 1]} : vector<2x128xf32> to vector<2x32xf32>
    %141 = math.tanh %140 : vector<2x32xf32>
    %142 = vector.extract_strided_slice %127 {offsets = [0, 96], sizes = [2, 32], strides = [1, 1]} : vector<2x128xf32> to vector<2x32xf32>
    %143 = arith.negf %142 : vector<2x32xf32>
    %144 = math.exp %143 : vector<2x32xf32>
    %cst_35 = arith.constant 1.000000e+00 : f32
    %145 = vector.broadcast %cst_35 : f32 to vector<2x32xf32>
    %146 = arith.addf %145, %144 : vector<2x32xf32>
    %147 = arith.divf %145, %146 : vector<2x32xf32>
    %148 = arith.mulf %139, %121 : vector<2x32xf32>
    %149 = arith.mulf %133, %141 : vector<2x32xf32>
    %150 = arith.addf %148, %149 : vector<2x32xf32>
    %151 = math.tanh %150 : vector<2x32xf32>
    %152 = arith.mulf %147, %151 : vector<2x32xf32>
    %c8 = arith.constant 8 : index
    %c0_36 = arith.constant 0 : index
    %153 = vector.load %arg11[%c8, %c0_36] : memref<16x32xf32, #tpu.memory_space<vmem>>, vector<2x32xf32>
    tpu.vector_store %arg11[%c8, %c0_36], %152 {strides = array<i32>} : memref<16x32xf32, #tpu.memory_space<vmem>>, vector<2x32xf32>,
    %154 = vector.extract_strided_slice %6 {offsets = [10, 0], sizes = [2, 128], strides = [1, 1]} : vector<16x128xf32> to vector<2x128xf32>
    %cst_37 = arith.constant dense<0.000000e+00> : vector<2x128xf32>
    %155 = tpu.matmul %152, %1, %cst_37 {dimension_numbers = #tpu.dot_dimension_numbers<[1], [0], [0], [1], [0, 0, 1, 1], [], []>} : vector<2x32xf32>, vector<32x128xf32>, vector<2x128xf32> -> vector<2x128xf32>
    %156 = arith.addf %154, %155 : vector<2x128xf32>
    %157 = vector.extract_strided_slice %156 {offsets = [0, 0], sizes = [2, 32], strides = [1, 1]} : vector<2x128xf32> to vector<2x32xf32>
    %158 = arith.negf %157 : vector<2x32xf32>
    %159 = math.exp %158 : vector<2x32xf32>
    %cst_38 = arith.constant 1.000000e+00 : f32
    %160 = vector.broadcast %cst_38 : f32 to vector<2x32xf32>
    %161 = arith.addf %160, %159 : vector<2x32xf32>
    %162 = arith.divf %160, %161 : vector<2x32xf32>
    %163 = vector.extract_strided_slice %156 {offsets = [0, 32], sizes = [2, 32], strides = [1, 1]} : vector<2x128xf32> to vector<2x32xf32>
    %164 = arith.negf %163 : vector<2x32xf32>
    %165 = math.exp %164 : vector<2x32xf32>
    %cst_39 = arith.constant 1.000000e+00 : f32
    %166 = vector.broadcast %cst_39 : f32 to vector<2x32xf32>
    %167 = arith.addf %166, %165 : vector<2x32xf32>
    %168 = arith.divf %166, %167 : vector<2x32xf32>
    %169 = vector.extract_strided_slice %156 {offsets = [0, 64], sizes = [2, 32], strides = [1, 1]} : vector<2x128xf32> to vector<2x32xf32>
    %170 = math.tanh %169 : vector<2x32xf32>
    %171 = vector.extract_strided_slice %156 {offsets = [0, 96], sizes = [2, 32], strides = [1, 1]} : vector<2x128xf32> to vector<2x32xf32>
    %172 = arith.negf %171 : vector<2x32xf32>
    %173 = math.exp %172 : vector<2x32xf32>
    %cst_40 = arith.constant 1.000000e+00 : f32
    %174 = vector.broadcast %cst_40 : f32 to vector<2x32xf32>
    %175 = arith.addf %174, %173 : vector<2x32xf32>
    %176 = arith.divf %174, %175 : vector<2x32xf32>
    %177 = arith.mulf %168, %150 : vector<2x32xf32>
    %178 = arith.mulf %162, %170 : vector<2x32xf32>
    %179 = arith.addf %177, %178 : vector<2x32xf32>
    %180 = math.tanh %179 : vector<2x32xf32>
    %181 = arith.mulf %176, %180 : vector<2x32xf32>
    %c10 = arith.constant 10 : index
    %c0_41 = arith.constant 0 : index
    %182 = vector.load %arg11[%c10, %c0_41] : memref<16x32xf32, #tpu.memory_space<vmem>>, vector<2x32xf32>
    tpu.vector_store %arg11[%c10, %c0_41], %181 {strides = array<i32>} : memref<16x32xf32, #tpu.memory_space<vmem>>, vector<2x32xf32>,
    %183 = vector.extract_strided_slice %6 {offsets = [12, 0], sizes = [2, 128], strides = [1, 1]} : vector<16x128xf32> to vector<2x128xf32>
    %cst_42 = arith.constant dense<0.000000e+00> : vector<2x128xf32>
    %184 = tpu.matmul %181, %1, %cst_42 {dimension_numbers = #tpu.dot_dimension_numbers<[1], [0], [0], [1], [0, 0, 1, 1], [], []>} : vector<2x32xf32>, vector<32x128xf32>, vector<2x128xf32> -> vector<2x128xf32>
    %185 = arith.addf %183, %184 : vector<2x128xf32>
    %186 = vector.extract_strided_slice %185 {offsets = [0, 0], sizes = [2, 32], strides = [1, 1]} : vector<2x128xf32> to vector<2x32xf32>
    %187 = arith.negf %186 : vector<2x32xf32>
    %188 = math.exp %187 : vector<2x32xf32>
    %cst_43 = arith.constant 1.000000e+00 : f32
    %189 = vector.broadcast %cst_43 : f32 to vector<2x32xf32>
    %190 = arith.addf %189, %188 : vector<2x32xf32>
    %191 = arith.divf %189, %190 : vector<2x32xf32>
    %192 = vector.extract_strided_slice %185 {offsets = [0, 32], sizes = [2, 32], strides = [1, 1]} : vector<2x128xf32> to vector<2x32xf32>
    %193 = arith.negf %192 : vector<2x32xf32>
    %194 = math.exp %193 : vector<2x32xf32>
    %cst_44 = arith.constant 1.000000e+00 : f32
    %195 = vector.broadcast %cst_44 : f32 to vector<2x32xf32>
    %196 = arith.addf %195, %194 : vector<2x32xf32>
    %197 = arith.divf %195, %196 : vector<2x32xf32>
    %198 = vector.extract_strided_slice %185 {offsets = [0, 64], sizes = [2, 32], strides = [1, 1]} : vector<2x128xf32> to vector<2x32xf32>
    %199 = math.tanh %198 : vector<2x32xf32>
    %200 = vector.extract_strided_slice %185 {offsets = [0, 96], sizes = [2, 32], strides = [1, 1]} : vector<2x128xf32> to vector<2x32xf32>
    %201 = arith.negf %200 : vector<2x32xf32>
    %202 = math.exp %201 : vector<2x32xf32>
    %cst_45 = arith.constant 1.000000e+00 : f32
    %203 = vector.broadcast %cst_45 : f32 to vector<2x32xf32>
    %204 = arith.addf %203, %202 : vector<2x32xf32>
    %205 = arith.divf %203, %204 : vector<2x32xf32>
    %206 = arith.mulf %197, %179 : vector<2x32xf32>
    %207 = arith.mulf %191, %199 : vector<2x32xf32>
    %208 = arith.addf %206, %207 : vector<2x32xf32>
    %209 = math.tanh %208 : vector<2x32xf32>
    %210 = arith.mulf %205, %209 : vector<2x32xf32>
    %c12 = arith.constant 12 : index
    %c0_46 = arith.constant 0 : index
    %211 = vector.load %arg11[%c12, %c0_46] : memref<16x32xf32, #tpu.memory_space<vmem>>, vector<2x32xf32>
    tpu.vector_store %arg11[%c12, %c0_46], %210 {strides = array<i32>} : memref<16x32xf32, #tpu.memory_space<vmem>>, vector<2x32xf32>,
    %212 = vector.extract_strided_slice %6 {offsets = [14, 0], sizes = [2, 128], strides = [1, 1]} : vector<16x128xf32> to vector<2x128xf32>
    %cst_47 = arith.constant dense<0.000000e+00> : vector<2x128xf32>
    %213 = tpu.matmul %210, %1, %cst_47 {dimension_numbers = #tpu.dot_dimension_numbers<[1], [0], [0], [1], [0, 0, 1, 1], [], []>} : vector<2x32xf32>, vector<32x128xf32>, vector<2x128xf32> -> vector<2x128xf32>
    %214 = arith.addf %212, %213 : vector<2x128xf32>
    %215 = vector.extract_strided_slice %214 {offsets = [0, 0], sizes = [2, 32], strides = [1, 1]} : vector<2x128xf32> to vector<2x32xf32>
    %216 = arith.negf %215 : vector<2x32xf32>
    %217 = math.exp %216 : vector<2x32xf32>
    %cst_48 = arith.constant 1.000000e+00 : f32
    %218 = vector.broadcast %cst_48 : f32 to vector<2x32xf32>
    %219 = arith.addf %218, %217 : vector<2x32xf32>
    %220 = arith.divf %218, %219 : vector<2x32xf32>
    %221 = vector.extract_strided_slice %214 {offsets = [0, 32], sizes = [2, 32], strides = [1, 1]} : vector<2x128xf32> to vector<2x32xf32>
    %222 = arith.negf %221 : vector<2x32xf32>
    %223 = math.exp %222 : vector<2x32xf32>
    %cst_49 = arith.constant 1.000000e+00 : f32
    %224 = vector.broadcast %cst_49 : f32 to vector<2x32xf32>
    %225 = arith.addf %224, %223 : vector<2x32xf32>
    %226 = arith.divf %224, %225 : vector<2x32xf32>
    %227 = vector.extract_strided_slice %214 {offsets = [0, 64], sizes = [2, 32], strides = [1, 1]} : vector<2x128xf32> to vector<2x32xf32>
    %228 = math.tanh %227 : vector<2x32xf32>
    %229 = vector.extract_strided_slice %214 {offsets = [0, 96], sizes = [2, 32], strides = [1, 1]} : vector<2x128xf32> to vector<2x32xf32>
    %230 = arith.negf %229 : vector<2x32xf32>
    %231 = math.exp %230 : vector<2x32xf32>
    %cst_50 = arith.constant 1.000000e+00 : f32
    %232 = vector.broadcast %cst_50 : f32 to vector<2x32xf32>
    %233 = arith.addf %232, %231 : vector<2x32xf32>
    %234 = arith.divf %232, %233 : vector<2x32xf32>
    %235 = arith.mulf %226, %208 : vector<2x32xf32>
    %236 = arith.mulf %220, %228 : vector<2x32xf32>
    %237 = arith.addf %235, %236 : vector<2x32xf32>
    %238 = math.tanh %237 : vector<2x32xf32>
    %239 = arith.mulf %234, %238 : vector<2x32xf32>
    %c14 = arith.constant 14 : index
    %c0_51 = arith.constant 0 : index
    %240 = vector.load %arg11[%c14, %c0_51] : memref<16x32xf32, #tpu.memory_space<vmem>>, vector<2x32xf32>
    tpu.vector_store %arg11[%c14, %c0_51], %239 {strides = array<i32>} : memref<16x32xf32, #tpu.memory_space<vmem>>, vector<2x32xf32>,
    %c0_52 = arith.constant 0 : index
    %c0_53 = arith.constant 0 : index
    %241 = vector.load %arg9[%c0_52, %c0_53] : memref<2x32xf32, #tpu.memory_space<vmem>>, vector<2x32xf32>
    tpu.vector_store %arg9[%c0_52, %c0_53], %239 {strides = array<i32>} : memref<2x32xf32, #tpu.memory_space<vmem>>, vector<2x32xf32>,
    %c0_54 = arith.constant 0 : index
    %c0_55 = arith.constant 0 : index
    %242 = vector.load %arg10[%c0_54, %c0_55] : memref<2x32xf32, #tpu.memory_space<vmem>>, vector<2x32xf32>
    tpu.vector_store %arg10[%c0_54, %c0_55], %237 {strides = array<i32>} : memref<2x32xf32, #tpu.memory_space<vmem>>, vector<2x32xf32>,
    %c0_56 = arith.constant 0 : index
    %c0_57 = arith.constant 0 : index
    %243 = vector.load %arg11[%c0_56, %c0_57] : memref<16x32xf32, #tpu.memory_space<vmem>>, vector<16x32xf32>
    %c0_58 = arith.constant 0 : index
    %c0_59 = arith.constant 0 : index
    %244 = vector.load %arg6[%c0_58, %c0_59] : memref<32x8xf32, #tpu.memory_space<vmem>>, vector<32x8xf32>
    %cst_60 = arith.constant dense<0.000000e+00> : vector<16x8xf32>
    %245 = tpu.matmul %243, %244, %cst_60 {dimension_numbers = #tpu.dot_dimension_numbers<[1], [0], [0], [1], [0, 0, 1, 1], [], []>} : vector<16x32xf32>, vector<32x8xf32>, vector<16x8xf32> -> vector<16x8xf32>
    %c0_61 = arith.constant 0 : index
    %c0_62 = arith.constant 0 : index
    %246 = vector.load %arg7[%c0_61, %c0_62] : memref<1x8xf32, #tpu.memory_space<vmem>>, vector<1x8xf32>
    %247 = vector.broadcast %246 : vector<1x8xf32> to vector<16x8xf32>
    %248 = arith.addf %245, %247 : vector<16x8xf32>
    %c0_63 = arith.constant 0 : index
    %c0_64 = arith.constant 0 : index
    %249 = vector.load %arg8[%c0_63, %c0_64] : memref<16x8xf32, #tpu.memory_space<vmem>>, vector<16x8xf32>
    tpu.vector_store %arg8[%c0_63, %c0_64], %248 {strides = array<i32>} : memref<16x8xf32, #tpu.memory_space<vmem>>, vector<16x8xf32>,
    return
  }
}

</mosaic_0001>

<bundles_post_ra>
// kernel: lstm_model_forward.1
= control target key start
LH: loop header
LB: loop body
LE: loop exit
PB: predicated region body
PF: predicated region fallthrough
CT: control target
= control target key end

     0   :  { %16 = vsyncpa [#allocation4], 0  ;;  %vm49_vm0 = vcmask 130048   ;;  %v1506_v3 = vmov 0.0|0.0   ;;  %vm1507_vm1 = vmmov 0   ;;  %v1508_v10 = vmov 0.0   ;;  %s1787_s0 = inlined_call_operand.vmem [shape: f32[16,16], index: 0, kind: input, shape index: {}]   ;;  %s1788_s1 = inlined_call_operand.vmem [shape: f32[2,32], index: 1, kind: input, shape index: {}]   ;;  %s1789_s2 = inlined_call_operand.vmem [shape: f32[2,32], index: 2, kind: input, shape index: {}]   ;;  %s1790_s3 = inlined_call_operand.vmem [shape: f32[16,128], index: 3, kind: input, shape index: {}]   ;;  %s1791_s4 = inlined_call_operand.vmem [shape: f32[32,128], index: 4, kind: input, shape index: {}]   ;;  %s1792_s5 = inlined_call_operand.vmem [shape: f32[1,128], index: 5, kind: input, shape index: {}]   ;;  %s1793_s6 = inlined_call_operand.vmem [shape: f32[32,8], index: 6, kind: input, shape index: {}]   ;;  %s1794_s7 = inlined_call_operand.vmem [shape: f32[1,8], index: 7, kind: input, shape index: {}]   ;;  %s1795_s8 = inlined_call_operand.vmem [shape: f32[16,8], index: 8, kind: output, shape index: {0}]   ;;  %s1796_s9 = inlined_call_operand.hbm [shape: f32[2,32], index: 9, kind: output, shape index: {1}]   ;;  %s1797_s10 = inlined_call_operand.hbm [shape: f32[2,32], index: 10, kind: output, shape index: {2}]  }
   0x1   :  { %v34_v0 = vld [vmem:[%s1790_s3] sm:$0xff]  ;;  %v35_v1 = vld [vmem:[%s1790_s3 + $0x8] sm:$0xff]  ;;  %1330 = vmatprep.subr.bf16.mxu1 %v1506_v3  ;;  %v38_v8 = vld [vmem:[%s1791_s4 + $0x10] sm:$0xff]  ;;  %1235 = vmatprep.mubr.msk.f32.mxu1 %vm1507_vm1, %v1508_v10 }
   0x2   :  { %v36_v2 = vld [vmem:[%s1791_s4] sm:$0xff]  ;;  %v1326_v4 = vpack.c.bf16 %v35_v1, %v34_v0  ;;  %v37_v5 = vld [vmem:[%s1791_s4 + $0x8] sm:$0xff]  ;;  %v39_v9 = vld [vmem:[%s1791_s4 + $0x18] sm:$0xff] }
   0x3   :  { %v41_v6 = vld [vmem:[%s1787_s0] sm:$0xff]  ;;  %v1585_v7 = vpack.c.bf16 %v37_v5, %v36_v2 }
   0x4   :  { %1224 = vmatprep.mubr.msk.f32.mxu0 %vm49_vm0, %v41_v6  ;;  %1327 = vmatprep.subr.bf16.mxu0 %v1326_v4 }
   0x5   :  { %17 = vsyncpa [#allocation6], 0  ;;  %1332 = vmatpush3.bf16.msra.mxu1 %v1585_v7  ;;  %1329 = vmatpush3.bf16.msra.mxu0 %v1326_v4  ;;  %v42_v11 = vld [vmem:[%s1787_s0 + $0x8] sm:$0xff]  ;;  %v1600_v12 = vpack.c.bf16 %v39_v9, %v38_v8  ;;  %v131_v13 = vld [vmem:[%s1788_s1] sm:$0x3]  ;;  %vm133_vm2 = vcmask 261120  }
   0x6   :  { %1333 = vmatprep.subr.bf16.mxu1 %v1506_v3  ;;  %1336 = vmatprep.subr.bf16.mxu0 %v1506_v3  ;;  %v1148_v14 = vld [vmem:[%s1792_s5] ss:$0 sm:$0xff]  ;;  %s1509_s29 = smov 64   ;;  %s1510_s5 = smov 32   ;;  %vm240_vm3 = vcmask 254976   ;;  %vm349_vm4 = vcmask 257026  }
   0x7   :  { %v132_v23 = vld [vmem:[%s1789_s2] sm:$0x3]  ;;  %s1511_s2 = smov 96   ;;  %vm573_vm5 = vcmask 261126   ;;  %vm461_vm6 = vcmask 259076   ;;  %s1513_s21 = smov [#allocation5]  }
   0x8   :  { %1225 = vmatmul.mubr.msk.f32.vlgmr.msra.gmra.mrb[0].mxu0 %vm49_vm0, %v42_v11  ;;  %s1134_s22 = sshll.u32 %s1513_s21, 4  ;;  %s1135_s22 = int_to_ptr.vmem [resolvable:$true] %s1134_s22 }
   0x9   :  { %1335 = vmatpush3.bf16.msra.mxu1 %v1600_v12  ;;  %1338 = vmatpush3.bf16.msra.mxu0 %v1585_v7 }
   0xa   :  { %1339 = vmatprep.subr.bf16.mxu0 %v1506_v3  ;;  %1246 = vmatprep.mubr.msk.f32.mxu0 %vm1507_vm1, %v1508_v10 }
   0xb   :  { %1342 = vmatprep.subr.bf16.mxu1 %v1506_v3 }
   0xc   :  { %1236 = vmatmul.mubr.msk.f32.vlgmr.msra.gmra.mrb[0].mxu1 %vm133_vm2, %v131_v13 }
   0xd   :  { %1341 = vmatpush3.bf16.msra.mxu0 %v1600_v12  ;;  %1344 = vmatpush3.bf16.msra.mxu1 %v1585_v7 }
   0xe   :  { %1345 = vmatprep.subr.bf16.mxu1 %v1506_v3  ;;  %1257 = vmatprep.mubr.msk.f32.mxu1 %vm1507_vm1, %v1508_v10 }
   0xf   :  { %1348 = vmatprep.subr.bf16.mxu0 %v1506_v3 }
  0x11   :  { %1347 = vmatpush3.bf16.msra.mxu1 %v1600_v12 }
  0x12   :  { %1354 = vmatprep.subr.bf16.mxu1 %v1506_v3 }
  0xdb   :  { %v1226_v15 = vpop.f32.mrb[0].mxu0 }
  0xdc   :  { %v1626_v16 = vadd.f32 %v1226_v15, %v1148_v14  ;;  %v122_v17 = vpop.f32.mrb[1].mxu0 }
  0xdd   :  { %v1628_v18 = vadd.f32 %v1148_v14, %v122_v17 }
  0xdf   :  { %v203_v19 = vpop.f32.mrb[0].mxu1 }
  0xe0   :  { %v207_v20 = vadd.f32 %v203_v19, %v1628_v18  ;;  %v1237_v21 = vpop.f32.mrb[1].mxu1 }
  0xe2   :  { %1394 = vtanh.f32 %v207_v20  ;;  %v1152_v24 = vmul.f32 -1.442695, %v207_v20 }
  0xe4   :  { %1396 = vpow2.f32 %v1152_v24 }
  0xec   :  { %v1395_v22 = vpop.eup %1394 }
  0xed   :  { %221 = vrot.lane.b32.xlu0 %v1395_v22, %s1509_s29 }
  0xee   :  { %v1397_v25 = vpop.eup %1396 }
  0xef   :  { %v211_v26 = vadd.f32 1.0, %v1397_v25 }
  0xf1   :  { %216 = vrot.lane.b32.xlu0 %v132_v23, %s1510_s5  ;;  %1398 = vrcp.f32 %v211_v26 }
  0xfb   :  { %v1399_v27 = vpop.eup %1398 }
 0x15f   :  { %v222_v28 = vpop.permute.xlu0 %221 }
 0x160   :  { %v224_v29 = vmul.f32 %v1399_v27, %v222_v28 }
 0x162   :  { %226 = vrot.lane.b32.xlu1 %v224_v29, %s1510_s5 }
 0x163   :  { %v217_v30 = vpop.permute.xlu0 %216 }
 0x164   :  { %v219_v31 = vmul.f32 %v1399_v27, %v217_v30 }
 0x1d4   :  { %v227_v32 = vpop.permute.xlu1 %226 }
 0x1d5   :  { %v229_v33 = vadd.f32 %v227_v32, %v219_v31 }
 0x1d7   :  { %1400 = vtanh.f32 %v229_v33  ;;  %v326_v49 = vrot.slane %v229_v33, 6 }
 0x1e1   :  { %v1401_v34 = vpop.eup %1400 }
 0x1e2   :  { %232 = vrot.lane.b32.xlu1 %v1401_v34, %s1509_s29 }
 0x254   :  { %v233_v35 = vpop.permute.xlu1 %232 }
 0x255   :  { %v235_v36 = vmul.f32 %v1399_v27, %v233_v35 }
 0x257   :  { %237 = vrot.lane.b32.xlu0 %v235_v36, %s1510_s5 }
 0x2c9   :  { %v238_v37 = vpop.permute.xlu0 %237 }
 0x2ca   :  { %241 = vst.msk [vmem:[#allocation2] sm:$0x3] %vm240_vm3, %v238_v37  ;;  %1247 = vmatmul.mubr.msk.f32.vlgmr.msra.gmra.mrb[2].mxu0 %vm133_vm2, %v238_v37 }
 0x2cb   :  { %1350 = vmatpush3.bf16.msra.mxu0 %v1585_v7  ;;  %1268 = vmatprep.mubr.msk.f32.mxu0 %vm1507_vm1, %v1508_v10 }
 0x2cc   :  { %1351 = vmatprep.subr.bf16.mxu0 %v1506_v3 }
 0x2cf   :  { %1353 = vmatpush3.bf16.msra.mxu0 %v1600_v12 }
 0x2d0   :  { %1360 = vmatprep.subr.bf16.mxu0 %v1506_v3 }
 0x39d   :  { %v310_v38 = vpop.f32.mrb[2].mxu0 }
 0x39e   :  { %v315_v39 = vrot.slane %v310_v38, 6  ;;  %v1248_v40 = vpop.f32.mrb[3].mxu0 }
 0x3a0   :  { %v317_v41 = vadd.f32 %v315_v39, %v1628_v18 }
 0x3a2   :  { %1402 = vtanh.f32 %v317_v41  ;;  %v1154_v43 = vmul.f32 -1.442695, %v317_v41 }
 0x3a4   :  { %1404 = vpow2.f32 %v1154_v43 }
 0x3ac   :  { %v1403_v42 = vpop.eup %1402 }
 0x3ad   :  { %330 = vrot.lane.b32.xlu1 %v1403_v42, %s1509_s29 }
 0x3ae   :  { %v1405_v44 = vpop.eup %1404 }
 0x3af   :  { %v321_v45 = vadd.f32 1.0, %v1405_v44 }
 0x3b1   :  { %1406 = vrcp.f32 %v321_v45 }
 0x3bb   :  { %v1407_v46 = vpop.eup %1406 }
 0x3bc   :  { %v328_v50 = vmul.f32 %v1407_v46, %v326_v49 }
 0x41f   :  { %v331_v47 = vpop.permute.xlu1 %330 }
 0x420   :  { %v333_v48 = vmul.f32 %v1407_v46, %v331_v47 }
 0x422   :  { %335 = vrot.lane.b32.xlu0 %v333_v48, %s1510_s5 }
 0x494   :  { %v336_v51 = vpop.permute.xlu0 %335 }
 0x495   :  { %v338_v52 = vadd.f32 %v336_v51, %v328_v50 }
 0x497   :  { %1408 = vtanh.f32 %v338_v52  ;;  %v438_v6 = vrot.slane %v338_v52, 6 }
 0x4a1   :  { %v1409_v53 = vpop.eup %1408 }
 0x4a2   :  { %341 = vrot.lane.b32.xlu1 %v1409_v53, %s1509_s29 }
 0x514   :  { %v342_v54 = vpop.permute.xlu1 %341 }
 0x515   :  { %v1651_v55 = vmul.f32 %v1407_v46, %v342_v54 }
 0x517   :  { %v351_v56 = vrot.slane %v1651_v55, 2 }
 0x519   :  { %352 = vrot.lane.b32.xlu0 %v351_v56, %s1510_s5 }
 0x58b   :  { %v353_v57 = vpop.permute.xlu0 %352 }
 0x58c   :  { %1258 = vmatmul.mubr.msk.f32.vlgmr.msra.gmra.mrb[2].mxu1 %vm133_vm2, %v353_v57 }
 0x58d   :  { %1356 = vmatpush3.bf16.msra.mxu1 %v1585_v7  ;;  %1279 = vmatprep.mubr.msk.f32.mxu1 %vm1507_vm1, %v1508_v10 }
 0x58e   :  { %1357 = vmatprep.subr.bf16.mxu1 %v1506_v3 }
 0x591   :  { %1359 = vmatpush3.bf16.msra.mxu1 %v1600_v12 }
 0x592   :  { %1366 = vmatprep.subr.bf16.mxu1 %v1506_v3 }
 0x65f   :  { %v422_v58 = vpop.f32.mrb[2].mxu1 }
 0x660   :  { %v427_v59 = vrot.slane %v422_v58, 4  ;;  %v1259_v60 = vpop.f32.mrb[3].mxu1 }
 0x662   :  { %v429_v61 = vadd.f32 %v427_v59, %v1628_v18 }
 0x664   :  { %1410 = vtanh.f32 %v429_v61  ;;  %v1156_v63 = vmul.f32 -1.442695, %v429_v61 }
 0x666   :  { %1412 = vpow2.f32 %v1156_v63 }
 0x66e   :  { %v1411_v62 = vpop.eup %1410 }
 0x66f   :  { %442 = vrot.lane.b32.xlu1 %v1411_v62, %s1509_s29 }
 0x670   :  { %v1413_v0 = vpop.eup %1412 }
 0x671   :  { %v433_v1 = vadd.f32 1.0, %v1413_v0 }
 0x673   :  { %1414 = vrcp.f32 %v433_v1 }
 0x67d   :  { %v1415_v2 = vpop.eup %1414 }
 0x67e   :  { %v440_v8 = vmul.f32 %v1415_v2, %v438_v6 }
 0x6e1   :  { %v443_v4 = vpop.permute.xlu1 %442 }
 0x6e2   :  { %v445_v5 = vmul.f32 %v1415_v2, %v443_v4 }
 0x6e4   :  { %447 = vrot.lane.b32.xlu0 %v445_v5, %s1510_s5 }
 0x756   :  { %v448_v9 = vpop.permute.xlu0 %447 }
 0x757   :  { %v450_v11 = vadd.f32 %v448_v9, %v440_v8 }
 0x759   :  { %1416 = vtanh.f32 %v450_v11  ;;  %v550_v31 = vrot.slane %v450_v11, 6 }
 0x763   :  { %v1417_v13 = vpop.eup %1416 }
 0x764   :  { %453 = vrot.lane.b32.xlu1 %v1417_v13, %s1509_s29 }
 0x7d6   :  { %v454_v14 = vpop.permute.xlu1 %453 }
 0x7d7   :  { %v1666_v15 = vmul.f32 %v1415_v2, %v454_v14 }
 0x7d9   :  { %v463_v17 = vrot.slane %v1666_v15, 4 }
 0x7db   :  { %464 = vrot.lane.b32.xlu0 %v463_v17, %s1510_s5 }
 0x84d   :  { %v465_v19 = vpop.permute.xlu0 %464 }
 0x84e   :  { %1269 = vmatmul.mubr.msk.f32.vlgmr.msra.gmra.mrb[4].mxu0 %vm133_vm2, %v465_v19 }
 0x84f   :  { %1362 = vmatpush3.bf16.msra.mxu0 %v1585_v7  ;;  %1290 = vmatprep.mubr.msk.f32.mxu0 %vm1507_vm1, %v1508_v10 }
 0x850   :  { %1363 = vmatprep.subr.bf16.mxu0 %v1506_v3 }
 0x853   :  { %1365 = vmatpush3.bf16.msra.mxu0 %v1600_v12 }
 0x854   :  { %1372 = vmatprep.subr.bf16.mxu0 %v1506_v3 }
 0x921   :  { %v534_v20 = vpop.f32.mrb[4].mxu0 }
 0x922   :  { %v539_v21 = vrot.slane %v534_v20, 2  ;;  %v1270_v22 = vpop.f32.mrb[5].mxu0 }
 0x924   :  { %v541_v23 = vadd.f32 %v539_v21, %v1628_v18 }
 0x926   :  { %1418 = vtanh.f32 %v541_v23  ;;  %v1158_v25 = vmul.f32 -1.442695, %v541_v23 }
 0x928   :  { %1420 = vpow2.f32 %v1158_v25 }
 0x930   :  { %v1419_v24 = vpop.eup %1418 }
 0x931   :  { %554 = vrot.lane.b32.xlu1 %v1419_v24, %s1509_s29 }
 0x932   :  { %v1421_v26 = vpop.eup %1420 }
 0x933   :  { %v545_v27 = vadd.f32 1.0, %v1421_v26 }
 0x935   :  { %1422 = vrcp.f32 %v545_v27 }
 0x93f   :  { %v1423_v28 = vpop.eup %1422 }
 0x940   :  { %v552_v32 = vmul.f32 %v1423_v28, %v550_v31 }
 0x9a3   :  { %v555_v29 = vpop.permute.xlu1 %554 }
 0x9a4   :  { %v557_v30 = vmul.f32 %v1423_v28, %v555_v29 }
 0x9a6   :  { %559 = vrot.lane.b32.xlu0 %v557_v30, %s1510_s5 }
 0xa18   :  { %v560_v33 = vpop.permute.xlu0 %559 }
 0xa19   :  { %v562_v34 = vadd.f32 %v560_v33, %v552_v32 }
 0xa1b   :  { %1424 = vtanh.f32 %v562_v34  ;;  %v659_v49 = vrot.slane %v562_v34, 6 }
 0xa25   :  { %v1425_v18 = vpop.eup %1424 }
 0xa26   :  { %565 = vrot.lane.b32.xlu1 %v1425_v18, %s1509_s29 }
 0xa98   :  { %v566_v35 = vpop.permute.xlu1 %565 }
 0xa99   :  { %v1681_v36 = vmul.f32 %v1423_v28, %v566_v35 }
 0xa9b   :  { %v575_v37 = vrot.slane %v1681_v36, 6 }
 0xa9d   :  { %576 = vrot.lane.b32.xlu0 %v575_v37, %s1510_s5 }
 0xb0f   :  { %v577_v38 = vpop.permute.xlu0 %576 }
 0xb10   :  { %1280 = vmatmul.mubr.msk.f32.vlgmr.msra.gmra.mrb[4].mxu1 %vm133_vm2, %v577_v38 }
 0xb11   :  { %1368 = vmatpush3.bf16.msra.mxu1 %v1585_v7  ;;  %1301 = vmatprep.mubr.msk.f32.mxu1 %vm1507_vm1, %v1508_v10 }
 0xb12   :  { %1369 = vmatprep.subr.bf16.mxu1 %v1506_v3 }
 0xb15   :  { %1371 = vmatpush3.bf16.msra.mxu1 %v1600_v12 }
 0xbe3   :  { %v646_v39 = vpop.f32.mrb[4].mxu1 }
 0xbe4   :  { %v650_v40 = vadd.f32 %v646_v39, %v1626_v16  ;;  %v1281_v41 = vpop.f32.mrb[5].mxu1 }
 0xbe6   :  { %1426 = vtanh.f32 %v650_v40  ;;  %v1160_v43 = vmul.f32 -1.442695, %v650_v40 }
 0xbe8   :  { %1428 = vpow2.f32 %v1160_v43 }
 0xbf0   :  { %v1427_v42 = vpop.eup %1426 }
 0xbf1   :  { %663 = vrot.lane.b32.xlu1 %v1427_v42, %s1509_s29 }
 0xbf2   :  { %v1429_v44 = vpop.eup %1428 }
 0xbf3   :  { %v654_v45 = vadd.f32 1.0, %v1429_v44 }
 0xbf5   :  { %1430 = vrcp.f32 %v654_v45 }
 0xbff   :  { %v1431_v46 = vpop.eup %1430 }
 0xc00   :  { %v661_v50 = vmul.f32 %v1431_v46, %v659_v49 }
 0xc63   :  { %v664_v47 = vpop.permute.xlu1 %663 }
 0xc64   :  { %v666_v48 = vmul.f32 %v1431_v46, %v664_v47 }
 0xc66   :  { %668 = vrot.lane.b32.xlu0 %v666_v48, %s1510_s5 }
 0xcd8   :  { %v669_v51 = vpop.permute.xlu0 %668 }
 0xcd9   :  { %v671_v52 = vadd.f32 %v669_v51, %v661_v50 }
 0xcdb   :  { %1432 = vtanh.f32 %v671_v52 }
 0xce5   :  { %v1433_v53 = vpop.eup %1432 }
 0xce6   :  { %674 = vrot.lane.b32.xlu1 %v1433_v53, %s1509_s29  ;;  %v1021_v53 = vld [vmem:[%s1793_s6] sm:$0xff] }
 0xd58   :  { %v675_v54 = vpop.permute.xlu1 %674 }
 0xd59   :  { %v677_v56 = vmul.f32 %v1431_v46, %v675_v54  ;;  %v1022_v54 = vld [vmem:[%s1793_s6 + $0x8] sm:$0xff] }
 0xd5b   :  { %679 = vrot.lane.b32.xlu0 %v677_v56, %s1510_s5  ;;  %v1378_v56 = vpack.c.bf16 %v1022_v54, %v1021_v53 }
 0xd5d   :  { %1379 = vmatprep.subr.bf16.mxu1 %v1378_v56 }
 0xdcd   :  { %v680_v57 = vpop.permute.xlu0 %679 }
 0xdce   :  { %682 = vst.msk [vmem:[#allocation2 + $0x8] sm:$0x3] %vm240_vm3, %v680_v57  ;;  %1291 = vmatmul.mubr.msk.f32.vlgmr.msra.gmra.mrb[6].mxu0 %vm133_vm2, %v680_v57 }
 0xdcf   :  { %1374 = vmatpush3.bf16.msra.mxu0 %v1585_v7  ;;  %1312 = vmatprep.mubr.msk.f32.mxu0 %vm1507_vm1, %v1508_v10 }
 0xdd0   :  { %1375 = vmatprep.subr.bf16.mxu0 %v1506_v3  ;;  %v767_v3 = vrot.slane %v671_v52, 6 }
 0xdd3   :  { %1377 = vmatpush3.bf16.msra.mxu0 %v1600_v12 }
 0xea1   :  { %v751_v58 = vpop.f32.mrb[6].mxu0 }
 0xea2   :  { %v756_v59 = vrot.slane %v751_v58, 6  ;;  %v1292_v60 = vpop.f32.mrb[7].mxu0  ;;  %v1024_v58 = vld [vmem:[%s1793_s6 + $0x18] sm:$0xff] }
 0xea4   :  { %v758_v61 = vadd.f32 %v756_v59, %v1626_v16 }
 0xea6   :  { %1434 = vtanh.f32 %v758_v61  ;;  %v1162_v63 = vmul.f32 -1.442695, %v758_v61 }
 0xea8   :  { %1436 = vpow2.f32 %v1162_v63 }
 0xeb0   :  { %v1435_v62 = vpop.eup %1434 }
 0xeb1   :  { %771 = vrot.lane.b32.xlu1 %v1435_v62, %s1509_s29 }
 0xeb2   :  { %v1437_v0 = vpop.eup %1436 }
 0xeb3   :  { %v762_v7 = vadd.f32 1.0, %v1437_v0 }
 0xeb5   :  { %1438 = vrcp.f32 %v762_v7 }
 0xebf   :  { %v1439_v1 = vpop.eup %1438 }
 0xec0   :  { %v769_v12 = vmul.f32 %v1439_v1, %v767_v3 }
 0xf23   :  { %v772_v10 = vpop.permute.xlu1 %771 }
 0xf24   :  { %v774_v2 = vmul.f32 %v1439_v1, %v772_v10 }
 0xf26   :  { %776 = vrot.lane.b32.xlu0 %v774_v2, %s1510_s5 }
 0xf98   :  { %v777_v4 = vpop.permute.xlu0 %776 }
 0xf99   :  { %v779_v5 = vadd.f32 %v777_v4, %v769_v12 }
 0xf9b   :  { %1440 = vtanh.f32 %v779_v5  ;;  %v878_v28 = vrot.slane %v779_v5, 6 }
 0xfa5   :  { %v1441_v6 = vpop.eup %1440 }
 0xfa6   :  { %782 = vrot.lane.b32.xlu1 %v1441_v6, %s1509_s29 }
0x1018   :  { %v783_v8 = vpop.permute.xlu1 %782 }
0x1019   :  { %v1707_v9 = vmul.f32 %v1439_v1, %v783_v8 }
0x101b   :  { %v791_v11 = vrot.slane %v1707_v9, 2 }
0x101d   :  { %792 = vrot.lane.b32.xlu0 %v791_v11, %s1510_s5 }
0x108f   :  { %v793_v13 = vpop.permute.xlu0 %792 }
0x1090   :  { %1302 = vmatmul.mubr.msk.f32.vlgmr.msra.gmra.mrb[6].mxu1 %vm133_vm2, %v793_v13 }
0x1091   :  { %1381 = vmatpush3.bf16.msra.mxu1 %v1378_v56 }
0x1163   :  { %v862_v14 = vpop.f32.mrb[6].mxu1 }
0x1164   :  { %v867_v17 = vrot.slane %v862_v14, 4  ;;  %v1303_v19 = vpop.f32.mrb[7].mxu1 }
0x1166   :  { %v869_v20 = vadd.f32 %v867_v17, %v1626_v16 }
0x1168   :  { %1442 = vtanh.f32 %v869_v20  ;;  %v1164_v22 = vmul.f32 -1.442695, %v869_v20 }
0x116a   :  { %1444 = vpow2.f32 %v1164_v22 }
0x1172   :  { %v1443_v21 = vpop.eup %1442 }
0x1173   :  { %882 = vrot.lane.b32.xlu1 %v1443_v21, %s1509_s29 }
0x1174   :  { %v1445_v23 = vpop.eup %1444 }
0x1175   :  { %v873_v24 = vadd.f32 1.0, %v1445_v23 }
0x1177   :  { %1446 = vrcp.f32 %v873_v24 }
0x1181   :  { %v1447_v25 = vpop.eup %1446 }
0x1182   :  { %v880_v29 = vmul.f32 %v1447_v25, %v878_v28 }
0x11e5   :  { %v883_v26 = vpop.permute.xlu1 %882 }
0x11e6   :  { %v885_v27 = vmul.f32 %v1447_v25, %v883_v26 }
0x11e8   :  { %887 = vrot.lane.b32.xlu0 %v885_v27, %s1510_s5 }
0x125a   :  { %v888_v30 = vpop.permute.xlu0 %887 }
0x125b   :  { %v890_v31 = vadd.f32 %v888_v30, %v880_v29 }
0x125d   :  { %1448 = vtanh.f32 %v890_v31 }
0x1267   :  { %v1449_v32 = vpop.eup %1448 }
0x1268   :  { %893 = vrot.lane.b32.xlu1 %v1449_v32, %s1509_s29 }
0x12da   :  { %v894_v33 = vpop.permute.xlu1 %893 }
0x12db   :  { %v896_v34 = vmul.f32 %v1447_v25, %v894_v33 }
0x12dd   :  { %v902_v18 = vrot.slane %v896_v34, 4 }
0x12df   :  { %903 = vrot.lane.b32.xlu0 %v902_v18, %s1510_s5 }
0x1351   :  { %v904_v35 = vpop.permute.xlu0 %903 }
0x1352   :  { %1313 = vmatmul.mubr.msk.f32.vlgmr.msra.gmra.mrb[8].mxu0 %vm133_vm2, %v904_v35 }
0x1425   :  { %v973_v37 = vpop.f32.mrb[8].mxu0 }
0x1426   :  { %v978_v38 = vrot.slane %v973_v37, 2  ;;  %v1314_v39 = vpop.f32.mrb[9].mxu0 }
0x1428   :  { %v980_v40 = vadd.f32 %v978_v38, %v1626_v16  ;;  %v989_v16 = vrot.slane %v890_v31, 6 }
0x142a   :  { %1450 = vtanh.f32 %v980_v40  ;;  %v1166_v42 = vmul.f32 -1.442695, %v980_v40 }
0x142c   :  { %1452 = vpow2.f32 %v1166_v42 }
0x1434   :  { %v1451_v41 = vpop.eup %1450 }
0x1435   :  { %993 = vrot.lane.b32.xlu1 %v1451_v41, %s1509_s29 }
0x1436   :  { %v1453_v43 = vpop.eup %1452 }
0x1437   :  { %v984_v44 = vadd.f32 1.0, %v1453_v43 }
0x1439   :  { %1454 = vrcp.f32 %v984_v44 }
0x1443   :  { %v1455_v45 = vpop.eup %1454 }
0x1444   :  { %v991_v48 = vmul.f32 %v1455_v45, %v989_v16 }
0x14a7   :  { %v994_v46 = vpop.permute.xlu1 %993 }
0x14a8   :  { %v996_v47 = vmul.f32 %v1455_v45, %v994_v46 }
0x14aa   :  { %998 = vrot.lane.b32.xlu0 %v996_v47, %s1510_s5 }
0x14ae   :  { %346 = vrot.lane.b32.xlu0 %v1651_v55, %s1510_s5 }
0x14b2   :  { %570 = vrot.lane.b32.xlu0 %v1681_v36, %s1510_s5 }
0x14b6   :  { %898 = vrot.lane.b32.xlu0 %v896_v34, %s1510_s5 }
0x151c   :  { %v999_v49 = vpop.permute.xlu0 %998 }
0x151d   :  { %v1001_v50 = vadd.f32 %v999_v49, %v991_v48 }
0x151f   :  { %1456 = vtanh.f32 %v1001_v50  ;;  %1015 = vrot.lane.b32.xlu0 %v1001_v50, %s1511_s2 }
0x1520   :  { %v347_v51 = vpop.permute.xlu0 %346 }
0x1521   :  { %350 = vst.msk [vmem:[#allocation2] sm:$0xc] %vm349_vm4, %v347_v51 }
0x1524   :  { %v571_v52 = vpop.permute.xlu0 %570 }
0x1525   :  { %574 = vst.msk [vmem:[#allocation2] sm:$0xc0] %vm573_vm5, %v571_v52 }
0x1528   :  { %v899_v55 = vpop.permute.xlu0 %898 }
0x1529   :  { %v1457_v36 = vpop.eup %1456  ;;  %901 = vst.msk [vmem:[#allocation2 + $0x8] sm:$0x30] %vm461_vm6, %v899_v55 }
0x152a   :  { %1004 = vrot.lane.b32.xlu1 %v1457_v36, %s1509_s29 }
0x152e   :  { %458 = vrot.lane.b32.xlu1 %v1666_v15, %s1510_s5  ;;  %v1023_v15 = vld [vmem:[%s1793_s6 + $0x10] sm:$0xff]  ;;  %s1512_s6 = smov [#allocation3]  }
0x152f   :  { %v1382_v59 = vpack.c.bf16 %v1024_v58, %v1023_v15  ;;  %s1124_s20 = sshll.u32 %s1512_s6, 4  ;;  %s1125_s20 = int_to_ptr.vmem [resolvable:$true] %s1124_s20 }
0x1530   :  { %s1458_s3 = scalar_lea.vmem %s1125_s20, 32  ;;  %p1463_p1 = scmp.lt.s32.totalorder %s1125_s20, %s1125_s20 }
0x1531   :  { %1383 = vmatprep.subr.bf16.mxu1 %v1382_v59  ;;  %p1459_p0 = scmp.ne.s32.totalorder %s1125_s20, %s1458_s3  ;;  %p1464_p2 = scmp.lt.s32.totalorder %s1458_s3, %s1458_s3 }
0x1532   :  { %787 = vrot.lane.b32.xlu1 %v1707_v9, %s1510_s5  ;;  %1385 = vmatpush3.bf16.msra.mxu1 %v1382_v59 }
0x1533   :  { %p1465_p3 = por %p1464_p2, %p1463_p1 }
0x1535   :  { %p1466_p4 = pnand %p1465_p3, %p1459_p0 }
0x1591   :  { %v1016_v57 = vpop.permute.xlu0 %1015 }
0x1592   :  { %1018 = vst.msk [vmem:[#allocation5 - $0x6] sm:$0xc0] %vm573_vm5, %v1016_v57 }
0x159c   :  { %v1005_v60 = vpop.permute.xlu1 %1004 }
0x159d   :  { %v1007_v61 = vmul.f32 %v1455_v45, %v1005_v60 }
0x159f   :  { %1009 = vrot.lane.b32.xlu1 %v1007_v61, %s1510_s5 }
0x15a0   :  { %v459_v62 = vpop.permute.xlu1 %458 }
0x15a1   :  { %462 = vst.msk [vmem:[#allocation2] sm:$0x30] %vm461_vm6, %v459_v62 }
0x15a4   :  { %v788_v63 = vpop.permute.xlu1 %787 }
0x15a5   :  { %790 = vst.msk [vmem:[#allocation2 + $0x8] sm:$0xc] %vm349_vm4, %v788_v63 }
0x15a8   :  { %v1019_v0 = vld [vmem:[#allocation2] sm:$0xff] }
0x15a9   :  { %1323 = vmatprep.mubr.msk.f32.mxu1 %vm133_vm2, %v1019_v0 }
0x1611   :  { %v1010_v7 = vpop.permute.xlu1 %1009 }
0x1612   :  { %1012 = vst.msk [vmem:[#allocation2 + $0x8] sm:$0xc0] %vm573_vm5, %v1010_v7  ;;  %1013 = vst.msk [vmem:[#allocation3 - $0x6] sm:$0xc0] %vm573_vm5, %v1010_v7 }
0x1619   :  { %v1020_v1 = vld [vmem:[#allocation2 + $0x8] sm:$0xff] }
0x161a   :  { %1324 = vmatmul.mubr.msk.f32.vlgmr.msra.gmra.mrb[8].mxu1 %vm133_vm2, %v1020_v1 }
0x161b   :  { %1469 = shalt.err (!%p1466_p4)
}
0x161c   :  { %s1470_s25 = scalar_lea.hbm %s1796_s9, 32 }
0x161d   :  { %p1471_p5 = scmp.ne.s32.totalorder %s1796_s9, %s1470_s25  ;;  %p1474_p6 = scmp.lt.u32.totalorder %s1470_s25, %s1796_s9 }
0x161f   :  { %p1476_p7 = pnand %p1474_p6, %p1471_p5 }
0x1621   :  { %1479 = shalt.err (!%p1476_p7)
}
0x1622   :  { %1127 = dma.vmem_to_hbm [thread:$0]  %s1125_s20, 32, %s1796_s9, [#allocation4]  }
0x1623   :  { %s1480_s29 = scalar_lea.vmem %s1135_s22, 32  ;;  %p1485_p9 = scmp.lt.s32.totalorder %s1135_s22, %s1135_s22 }
0x1624   :  { %p1481_p8 = scmp.ne.s32.totalorder %s1135_s22, %s1480_s29  ;;  %p1486_p10 = scmp.lt.s32.totalorder %s1480_s29, %s1480_s29 }
0x1626   :  { %p1487_p11 = por %p1486_p10, %p1485_p9 }
0x1628   :  { %p1488_p12 = pnand %p1487_p11, %p1481_p8 }
0x162a   :  { %1491 = shalt.err (!%p1488_p12)
}
0x162b   :  { %s1492_s5 = scalar_lea.hbm %s1797_s10, 32 }
0x162c   :  { %p1493_p13 = scmp.ne.s32.totalorder %s1797_s10, %s1492_s5  ;;  %p1496_p0 = scmp.lt.u32.totalorder %s1492_s5, %s1797_s10 }
0x162e   :  { %p1498_p1 = pnand %p1496_p0, %p1493_p13 }
0x1630   :  { %1501 = shalt.err (!%p1498_p1)
}
0x1631   :  { %1137 = dma.vmem_to_hbm [thread:$0]  %s1135_s22, 32, %s1797_s10, [#allocation6]   ;;  %v1167_v10 = vld [vmem:[%s1794_s7] ss:$0 sm:$0xff]  ;;  %vm1113_vm7 = vcmask 64512  }
0x16ed   :  { %v1325_v2 = vpop.f32.mrb[8].mxu1 }
0x16ee   :  { %v1110_v3 = vadd.f32 %v1325_v2, %v1167_v10  ;;  %v1104_v12 = vpop.f32.mrb[9].mxu1 }
0x16ef   :  { %v1105_v4 = vadd.f32 %v1167_v10, %v1104_v12 }
0x16f0   :  { %1115 = vst.msk [vmem:[%s1795_s8 + $0x8] sm:$0xff] %vm1113_vm7, %v1110_v3 }
0x16f1   :  { %1114 = vst.msk [vmem:[%s1795_s8] sm:$0xff] %vm1113_vm7, %v1105_v4 }
0x16f2   :  { %1502 = dma.done.wait [#allocation4], 32  }
0x16f3   :  { %1503 = vsyncadd [#allocation4], 4294967264 }
0x16f4   :  { %1504 = dma.done.wait [#allocation6], 32  }
0x16f5   :  { %1505 = vsyncadd [#allocation6], 4294967264 }
0x16f6   :  { %1146 = vsyncpa [#allocation4], 1 }
0x16f7   :  { %1147 = vsyncpa [#allocation6], 1 }

</bundles_post_ra>
